<compile_context>
chip_gen: v7x
topology: tpu7x:2x2x1
jax: 0.10.0
libtpu: 0.0.40
codegen_flags: <defaults>
</compile_context>

<pallas_src>
import functools

import jax
import jax.numpy as jnp
from jax import lax
from jax.experimental import pallas as pl
from jax.experimental.pallas import tpu as pltpu

EPS = 1e-12  # torch F.normalize eps


def _vlad_kernel(x_ref, wc_ref, wa_ref, cent_ref, ba_ref, out_ref, *,
                 s_valid, mxu_dtype):
    # x_ref    : (B, C, S_pad) bf16/f32 — B batch elements per grid step
    # wc_ref   : (K, C) f32  cluster-assignment conv weight (vladv2=False: no bias)
    # wa_ref   : (C, 1) f32  attention conv weight (C -> 1), sublane-major
    # cent_ref : (K, C) f32  centroids
    # ba_ref   : (1,)   f32  attention conv bias, in SMEM
    # out_ref  : (B, K, C) f32  fully-normalized per-batch VLAD
    B, C, S = x_ref.shape
    bias = ba_ref[0]
    wa = wa_ref[...]                              # (C, 1)
    cent = cent_ref[...]                          # (K, C)
    wc_m = wc_ref[...].astype(mxu_dtype)          # cast once, hoisted out of the b-loop

    if s_valid < S:   # static: only emit the mask when spatial padding exists
        col = lax.broadcasted_iota(jnp.int32, (1, S), 1)
        valid = col < s_valid
    else:
        valid = None

    def body(b, carry):
        xb = x_ref[b]                                          # (C, S) stream dtype
        x = xb.astype(jnp.float32)                             # f32 for all VPU math

        # attention head: relu -> 1x1 conv (C->1) + bias -> relu (VPU mul +
        # sublane reduce; only worth moving to the MXU if VALU is the binding slot)
        hmp = jnp.sum(jnp.maximum(x, 0.0) * wa, axis=0, keepdims=True) + bias
        hmp = jnp.maximum(hmp, 0.0)                            # (1, S)
        if valid is not None:
            hmp = jnp.where(valid, hmp, 0.0)   # padded columns must not count

        # per-column inverse L2 norm (F.normalize denominator), kept un-broadcast:
        # folded into (K,S)-sized operands below, so the (C,S) x_n buffer and the
        # broadcasted divide are never materialized.
        inv_nrm = pl.reciprocal(
            jnp.maximum(jnp.sqrt(jnp.sum(x * x, axis=0, keepdims=True)), EPS),
            approx=False)                                      # (1, S)

        # soft assignment: 1x1 conv on raw x, then scale logits by inv_nrm (the
        # per-column scale commutes out of the C-contraction).  bf16 MXU
        # operands, f32 accumulation.
        logits = jnp.dot(wc_m, xb.astype(mxu_dtype),
                         preferred_element_type=jnp.float32) * inv_nrm   # (K, S)
        logits = logits - jnp.max(logits, axis=0, keepdims=True)
        e = jnp.exp(logits)
        a = e * pl.reciprocal(jnp.sum(e, axis=0, keepdims=True), approx=False)

        # VLAD aggregation weighted by the attention heatmap:
        #   vlad[k,c] = sum_s x_n[c,s]*a[k,s]*h[s] - cent[k,c]*sum_s a[k,s]*h[s]
        ah = a * hmp                                           # (K, S)
        ahw = ah * inv_nrm                                     # normalization folded in
        # contract the shared last (S) axis directly (flash-attention q.k^T
        # pattern): the big (C,S) operand is on the RHS, so any operand
        # transpose lands on the small (K,S) side.
        term1 = lax.dot_general(ahw.astype(mxu_dtype), xb.astype(mxu_dtype),
                                (((1,), (1,)), ((), ())),
                                preferred_element_type=jnp.float32)      # (K, C)
        s_ah = jnp.sum(ah, axis=1, keepdims=True)              # (K, 1)
        vlad = term1 - cent * s_ah                             # (K, C)

        # intra-normalization (per cluster, over C): reciprocal of the reduced
        # (K,1) tensor, no broadcasted f32 divide.
        inv_vn = pl.reciprocal(
            jnp.maximum(jnp.sqrt(jnp.sum(vlad * vlad, axis=1, keepdims=True)), EPS),
            approx=False)
        vlad = vlad * inv_vn

        # global L2 normalization over the flattened (K*C) descriptor
        inv_gn = pl.reciprocal(
            jnp.maximum(jnp.sqrt(jnp.sum(vlad * vlad, keepdims=True)), EPS),
            approx=False)
        out_ref[b] = vlad * inv_gn
        return carry

    # fori_loop (not a static Python loop) bounds per-batch live ranges so the
    # (C,S)/(K,S) f32 temporaries are charged once, not block_n times.
    lax.fori_loop(0, B, body, 0)


def _vmem_config():
    """Generation-aware (vmem_budget, vmem_limit, two_tensorcores)."""
    try:
        info = pltpu.get_tpu_info()
        cap = int(getattr(info, "vmem_capacity_bytes", 0)) or 128 * 1024 * 1024
    except Exception:
        cap = 128 * 1024 * 1024
    if cap <= 64 * 1024 * 1024:
        # v7x-class: 64 MiB per TC, 2 TCs share the "parallel" grid axis.
        return 40 * 1024 * 1024, 48 * 1024 * 1024, True
    # v5e / v6e: 128 MiB physical VMEM, single TensorCore.
    return 88 * 1024 * 1024, 100 * 1024 * 1024, False


def _choose_block_n(N, C, S_pad, K, *, stream_bytes, vmem_budget_bytes,
                    two_cores, cap=16):
    """Batch elements per grid step.

    Per-batch-element cost is only the double-buffered streamed x block (plus
    the small f32 output block); the in-loop f32 temporaries are bounded by the
    fori_loop to a single batch element, so they are charged once.
    """
    per_b = 2 * stream_bytes * C * S_pad + 2 * 4 * K * C     # streamed x + out, dbl-buffered
    fixed = 12 * C * S_pad + 24 * K * S_pad + 32 * K * C     # in-loop f32 temps (one b) + weights
    avail = max(vmem_budget_bytes - fixed, per_b)
    bn = int(max(1, min(avail // per_b, cap, N)))
    if two_cores and N >= 2:
        # >= 2 grid steps so both TensorCores get work; prefer an even step count.
        bn = min(bn, (N + 1) // 2)
        for cand in range(bn, max(1, bn // 2) - 1, -1):
            if ((N + cand - 1) // cand) % 2 == 0:
                bn = cand
                break
    return int(max(1, bn))


def atten_netvlad_forward(x_nchw, conv_w, atten_w, atten_b, centroids, *,
                          x_dtype=jnp.bfloat16, mxu_dtype=jnp.bfloat16,
                          block_n=None):
    """x_nchw: (N, C, H, W). Returns (N, K*C) VLAD descriptor (float32)."""
    N, C, H, W = x_nchw.shape
    K = conv_w.shape[0]
    S = H * W
    S_pad = ((S + 127) // 128) * 128          # lane-dense spatial axis

    # NOTE: the pre-pass (reshape+pad+cast) is a single fused element-wise XLA
    # pass; streaming x as bf16 halves the kernel's HBM read.  If x already
    # lives in HBM as bf16, no extra traffic is generated.
    x = x_nchw.reshape(N, C, S)
    if S_pad != S:
        x = jnp.pad(x, ((0, 0), (0, 0), (0, S_pad - S)))
    if x.dtype != x_dtype:
        x = x.astype(x_dtype)

    vmem_budget, vmem_limit, two_cores = _vmem_config()
    if block_n is None:
        block_n = _choose_block_n(
            N, C, S_pad, K,
            stream_bytes=jnp.dtype(x_dtype).itemsize,
            vmem_budget_bytes=vmem_budget, two_cores=two_cores)
    N_pad = ((N + block_n - 1) // block_n) * block_n
    if N_pad != N:                            # zero-padded batch rows: output discarded
        x = jnp.pad(x, ((0, N_pad - N), (0, 0), (0, 0)))

    wc = conv_w.astype(jnp.float32)                   # (K, C)
    wa = atten_w.reshape(C, 1).astype(jnp.float32)    # (C, 1) sublane-major
    ba = atten_b.reshape(1).astype(jnp.float32)       # (1,) -> SMEM
    cent = centroids.astype(jnp.float32)              # (K, C)

    kernel = functools.partial(_vlad_kernel, s_valid=S, mxu_dtype=mxu_dtype)

    out = pl.pallas_call(
        kernel,
        out_shape=jax.ShapeDtypeStruct((N_pad, K, C), jnp.float32),
        grid_spec=pltpu.PrefetchScalarGridSpec(
            num_scalar_prefetch=0,
            grid=(N_pad // block_n,),
            in_specs=[
                pl.BlockSpec((block_n, C, S_pad), lambda n: (n, 0, 0)),   # x
                pl.BlockSpec((K, C), lambda n: (0, 0)),                   # conv weight
                pl.BlockSpec((C, 1), lambda n: (0, 0)),                   # attention weight
                pl.BlockSpec((K, C), lambda n: (0, 0)),                   # centroids
                pl.BlockSpec(memory_space=pltpu.MemorySpace.SMEM),        # attention bias
            ],
            out_specs=pl.BlockSpec((block_n, K, C), lambda n: (n, 0, 0)),
        ),
        compiler_params=pltpu.CompilerParams(
            dimension_semantics=("parallel",),
            vmem_limit_bytes=vmem_limit,
        ),
    )(x, wc, wa, cent, ba)

    return out[:N].reshape(N, K * C)


def _reference_forward(x_nchw, conv_w, atten_w, atten_b, centroids):
    """Pure-JAX reference mirroring the PyTorch forward (default config)."""
    hi = jax.lax.Precision.HIGHEST
    N, C, H, W = x_nchw.shape
    x = x_nchw.reshape(N, C, H * W).astype(jnp.float32)
    xr = jnp.maximum(x, 0.0)
    hmp = jnp.einsum('oc,ncs->nos', atten_w, xr, precision=hi) + atten_b[0]
    hmp = jnp.maximum(hmp, 0.0)                                   # (N,1,S)
    nrm = jnp.sqrt(jnp.sum(x * x, axis=1, keepdims=True))
    xn = x / jnp.maximum(nrm, EPS)
    logits = jnp.einsum('kc,ncs->nks', conv_w, xn, precision=hi)
    a = jax.nn.softmax(logits, axis=1)
    ah = a * hmp
    term1 = jnp.einsum('nks,ncs->nkc', ah, xn, precision=hi)
    vlad = term1 - centroids[None] * jnp.sum(ah, axis=2)[..., None]
    vn = jnp.sqrt(jnp.sum(vlad * vlad, axis=2, keepdims=True))
    vlad = vlad / jnp.maximum(vn, EPS)
    vf = vlad.reshape(N, -1)
    gn = jnp.sqrt(jnp.sum(vf * vf, axis=1, keepdims=True))
    return vf / jnp.maximum(gn, EPS)


if __name__ == "__main__":
    # Small shapes consistent with the module (dim -> C, num_clusters -> K).
    N, C, H, W = 2, 32, 8, 8
    K = 16

    key = jax.random.PRNGKey(0)
    k1, k2, k3, k4, k5 = jax.random.split(key, 5)

    x = jax.random.normal(k1, (N, C, H, W), dtype=jnp.float32)
    # Conv2d(dim, num_clusters, 1x1, bias=False) -> weight (K, C)
    conv_w = jax.random.normal(k2, (K, C), dtype=jnp.float32) * (1.0 / jnp.sqrt(C))
    # attention Conv2d(dim, 1, 1x1) -> weight (1, C), bias (1,)
    atten_w = jax.random.normal(k3, (1, C), dtype=jnp.float32) * (1.0 / jnp.sqrt(C))
    atten_b = jax.random.normal(k4, (1,), dtype=jnp.float32) * 0.1
    # centroids = torch.rand(K, dim) -> uniform [0,1)
    centroids = jax.random.uniform(k5, (K, C), dtype=jnp.float32)

    out = atten_netvlad_forward(x, conv_w, atten_w, atten_b, centroids)
    out = jax.block_until_ready(out)

    # Kernel streams x as bf16 and feeds the MXU bf16 operands (f32 accumulate,
    # f32 element-wise math).  Compare against the f32 reference on the same
    # bf16-quantized input; tolerance relaxed to cover the ~0.4% relative error
    # introduced by bf16 MXU operands (intentional accuracy/perf contract).
    xq = x.astype(jnp.bfloat16).astype(jnp.float32)
    ref = _reference_forward(xq, conv_w, atten_w, atten_b, centroids)

    assert out.shape == (N, K * C)
    max_err = float(jnp.max(jnp.abs(out - ref)))
    assert jnp.allclose(out, ref, atol=3e-3, rtol=3e-3), \
        f"mismatch vs reference (max abs err {max_err})"
    print("KERNEL_OK")
</pallas_src>

<mosaic_0001>
module attributes {stable_mosaic.version = 11 : i64} {
  func.func @_vlad_kernel(%arg0: i32, %arg1: memref<2x32x128xbf16, #tpu.memory_space<vmem>>, %arg2: memref<16x32xf32, #tpu.memory_space<vmem>>, %arg3: memref<32x1xf32, #tpu.memory_space<vmem>>, %arg4: memref<16x32xf32, #tpu.memory_space<vmem>>, %arg5: memref<1xf32, #tpu.memory_space<smem>>, %arg6: memref<2x16x32xf32, #tpu.memory_space<vmem>>) attributes {dimension_semantics = [#tpu.dimension_semantics<parallel>], iteration_bounds = array<i64: 1>, scalar_prefetch = 0 : i64, scratch_operands = 0 : i64, tpu.core_type = #tpu.core_type<tc>, window_params = [{transform_indices = @transform_0, window_bounds = array<i64: 2, 32, 128>}, {pipeline_mode = #tpu.pipeline_mode<synchronous>, transform_indices = @transform_1, window_bounds = array<i64: 16, 32>}, {pipeline_mode = #tpu.pipeline_mode<synchronous>, transform_indices = @transform_2, window_bounds = array<i64: 32, 1>}, {pipeline_mode = #tpu.pipeline_mode<synchronous>, transform_indices = @transform_3, window_bounds = array<i64: 16, 32>}, {transform_indices = @transform_4, window_bounds = array<i64: 1>}, {transform_indices = @transform_5, window_bounds = array<i64: 2, 16, 32>}]} {
    %c0 = arith.constant 0 : index
    %0 = memref.load %arg5[%c0] : memref<1xf32, #tpu.memory_space<smem>>
    %c0_0 = arith.constant 0 : index
    %c0_1 = arith.constant 0 : index
    %1 = vector.load %arg3[%c0_0, %c0_1] : memref<32x1xf32, #tpu.memory_space<vmem>>, vector<32x1xf32>
    %c0_2 = arith.constant 0 : index
    %c0_3 = arith.constant 0 : index
    %2 = vector.load %arg4[%c0_2, %c0_3] : memref<16x32xf32, #tpu.memory_space<vmem>>, vector<16x32xf32>
    %c0_4 = arith.constant 0 : index
    %c0_5 = arith.constant 0 : index
    %3 = vector.load %arg2[%c0_4, %c0_5] : memref<16x32xf32, #tpu.memory_space<vmem>>, vector<16x32xf32>
    %4 = arith.truncf %3 : vector<16x32xf32> to vector<16x32xbf16>
    %5 = tpu.iota {dimensions = array<i32: 1>} : vector<1x128xi32>
    %c64_i32 = arith.constant 64 : i32
    %6 = vector.broadcast %c64_i32 : i32 to vector<1x128xi32>
    %7 = arith.cmpi slt, %5, %6 : vector<1x128xi32>
    %c0_i32 = arith.constant 0 : i32
    %c2_i32 = arith.constant 2 : i32
    %8 = arith.addi %c0_i32, %c2_i32 : i32
    %c1_i32 = arith.constant 1 : i32
    scf.for %arg7 = %c0_i32 to %8 step %c1_i32  : i32 {
      %9 = arith.index_cast %arg7 : i32 to index
      %c0_7 = arith.constant 0 : index
      %c0_8 = arith.constant 0 : index
      %10 = vector.load %arg1[%9, %c0_7, %c0_8] : memref<2x32x128xbf16, #tpu.memory_space<vmem>>, vector<1x32x128xbf16>
      %11 = vector.shape_cast %10 : vector<1x32x128xbf16> to vector<32x128xbf16>
      %12 = arith.extf %11 : vector<32x128xbf16> to vector<32x128xf32>
      %cst = arith.constant 0.000000e+00 : f32
      %13 = vector.broadcast %cst : f32 to vector<32x128xf32>
      %14 = arith.maximumf %12, %13 : vector<32x128xf32>
      %15 = vector.broadcast %1 : vector<32x1xf32> to vector<32x128xf32>
      %16 = arith.mulf %14, %15 : vector<32x128xf32>
      %cst_9 = arith.constant dense<0.000000e+00> : vector<128xf32>
      %17 = vector.multi_reduction <add>, %16, %cst_9 [0] : vector<32x128xf32> to vector<128xf32>
      %18 = vector.shape_cast %17 : vector<128xf32> to vector<1x128xf32>
      %19 = vector.broadcast %0 : f32 to vector<1x128xf32>
      %20 = arith.addf %18, %19 : vector<1x128xf32>
      %cst_10 = arith.constant 0.000000e+00 : f32
      %21 = vector.broadcast %cst_10 : f32 to vector<1x128xf32>
      %22 = arith.maximumf %20, %21 : vector<1x128xf32>
      %cst_11 = arith.constant 0.000000e+00 : f32
      %23 = vector.broadcast %cst_11 : f32 to vector<1x128xf32>
      %24 = arith.select %7, %22, %23 : vector<1x128xi1>, vector<1x128xf32>
      %25 = arith.mulf %12, %12 : vector<32x128xf32>
      %cst_12 = arith.constant dense<0.000000e+00> : vector<128xf32>
      %26 = vector.multi_reduction <add>, %25, %cst_12 [0] : vector<32x128xf32> to vector<128xf32>
      %27 = vector.shape_cast %26 : vector<128xf32> to vector<1x128xf32>
      %28 = math.sqrt %27 : vector<1x128xf32>
      %cst_13 = arith.constant 9.99999996E-13 : f32
      %29 = vector.broadcast %cst_13 : f32 to vector<1x128xf32>
      %30 = arith.maximumf %28, %29 : vector<1x128xf32>
      %31 = tpu.reciprocal %30 : vector<1x128xf32> -> vector<1x128xf32>
      %cst_14 = arith.constant dense<0.000000e+00> : vector<16x128xf32>
      %32 = tpu.matmul %4, %11, %cst_14 {dimension_numbers = #tpu.dot_dimension_numbers<[1], [0], [0], [1], [0, 0, 1, 1], [], []>} : vector<16x32xbf16>, vector<32x128xbf16>, vector<16x128xf32> -> vector<16x128xf32>
      %33 = vector.broadcast %31 : vector<1x128xf32> to vector<16x128xf32>
      %34 = arith.mulf %32, %33 : vector<16x128xf32>
      %cst_15 = arith.constant dense<0xFF800000> : vector<128xf32>
      %35 = vector.multi_reduction <maximumf>, %34, %cst_15 [0] : vector<16x128xf32> to vector<128xf32>
      %36 = vector.shape_cast %35 : vector<128xf32> to vector<1x128xf32>
      %37 = vector.broadcast %36 : vector<1x128xf32> to vector<16x128xf32>
      %38 = arith.subf %34, %37 : vector<16x128xf32>
      %39 = math.exp %38 : vector<16x128xf32>
      %cst_16 = arith.constant dense<0.000000e+00> : vector<128xf32>
      %40 = vector.multi_reduction <add>, %39, %cst_16 [0] : vector<16x128xf32> to vector<128xf32>
      %41 = vector.shape_cast %40 : vector<128xf32> to vector<1x128xf32>
      %42 = tpu.reciprocal %41 : vector<1x128xf32> -> vector<1x128xf32>
      %43 = vector.broadcast %42 : vector<1x128xf32> to vector<16x128xf32>
      %44 = arith.mulf %39, %43 : vector<16x128xf32>
      %45 = vector.broadcast %24 : vector<1x128xf32> to vector<16x128xf32>
      %46 = arith.mulf %44, %45 : vector<16x128xf32>
      %47 = vector.broadcast %31 : vector<1x128xf32> to vector<16x128xf32>
      %48 = arith.mulf %46, %47 : vector<16x128xf32>
      %49 = arith.truncf %48 : vector<16x128xf32> to vector<16x128xbf16>
      %cst_17 = arith.constant dense<0.000000e+00> : vector<16x32xf32>
      %50 = tpu.matmul %49, %11, %cst_17 {dimension_numbers = #tpu.dot_dimension_numbers<[1], [1], [0], [0], [0, 0, 1, 0], [], []>} : vector<16x128xbf16>, vector<32x128xbf16>, vector<16x32xf32> -> vector<16x32xf32>
      %cst_18 = arith.constant dense<0.000000e+00> : vector<16xf32>
      %51 = vector.multi_reduction <add>, %46, %cst_18 [1] : vector<16x128xf32> to vector<16xf32>
      %52 = vector.shape_cast %51 : vector<16xf32> to vector<16x1xf32>
      %53 = vector.broadcast %52 : vector<16x1xf32> to vector<16x32xf32>
      %54 = arith.mulf %2, %53 : vector<16x32xf32>
      %55 = arith.subf %50, %54 : vector<16x32xf32>
      %56 = arith.mulf %55, %55 : vector<16x32xf32>
      %cst_19 = arith.constant dense<0.000000e+00> : vector<16xf32>
      %57 = vector.multi_reduction <add>, %56, %cst_19 [1] : vector<16x32xf32> to vector<16xf32>
      %58 = vector.shape_cast %57 : vector<16xf32> to vector<16x1xf32>
      %59 = math.sqrt %58 : vector<16x1xf32>
      %cst_20 = arith.constant 9.99999996E-13 : f32
      %60 = vector.broadcast %cst_20 : f32 to vector<16x1xf32>
      %61 = arith.maximumf %59, %60 : vector<16x1xf32>
      %62 = tpu.reciprocal %61 : vector<16x1xf32> -> vector<16x1xf32>
      %63 = vector.broadcast %62 : vector<16x1xf32> to vector<16x32xf32>
      %64 = arith.mulf %55, %63 : vector<16x32xf32>
      %65 = arith.mulf %64, %64 : vector<16x32xf32>
      %66 = vector.shape_cast %65 : vector<16x32xf32> to vector<1x16x32xf32>
      %cst_21 = arith.constant dense<0.000000e+00> : vector<1xf32>
      %67 = vector.multi_reduction <add>, %66, %cst_21 [1, 2] : vector<1x16x32xf32> to vector<1xf32>
      %68 = vector.shape_cast %67 : vector<1xf32> to vector<1x1x1xf32>
      %69 = vector.extract %68[0, 0, 0] : f32 from vector<1x1x1xf32>
      %70 = vector.broadcast %69 : f32 to vector<1x1xf32>
      %71 = math.sqrt %70 : vector<1x1xf32>
      %cst_22 = arith.constant 9.99999996E-13 : f32
      %72 = vector.broadcast %cst_22 : f32 to vector<1x1xf32>
      %73 = arith.maximumf %71, %72 : vector<1x1xf32>
      %74 = tpu.reciprocal %73 : vector<1x1xf32> -> vector<1x1xf32>
      %75 = vector.broadcast %74 : vector<1x1xf32> to vector<16x32xf32>
      %76 = arith.mulf %64, %75 : vector<16x32xf32>
      %77 = arith.index_cast %arg7 : i32 to index
      %c0_23 = arith.constant 0 : index
      %c0_24 = arith.constant 0 : index
      %78 = vector.load %arg6[%77, %c0_23, %c0_24] : memref<2x16x32xf32, #tpu.memory_space<vmem>>, vector<1x16x32xf32>
      %79 = vector.shape_cast %78 : vector<1x16x32xf32> to vector<16x32xf32>
      %80 = vector.shape_cast %76 : vector<16x32xf32> to vector<1x16x32xf32>
      tpu.vector_store %arg6[%77, %c0_23, %c0_24], %80 {strides = array<i32>} : memref<2x16x32xf32, #tpu.memory_space<vmem>>, vector<1x16x32xf32>,
    }
    %c2_i32_6 = arith.constant 2 : i32
    return
  }
  func.func @transform_0(%arg0: i32) -> (i32, i32, i32) {
    %c0_i32 = arith.constant 0 : i32
    %c0_i32_0 = arith.constant 0 : i32
    %c0_i32_1 = arith.constant 0 : i32
    return %arg0, %c0_i32, %c0_i32_0 : i32, i32, i32
  }
  func.func @transform_1(%arg0: i32) -> (i32, i32) {
    %c0_i32 = arith.constant 0 : i32
    %c0_i32_0 = arith.constant 0 : i32
    %c0_i32_1 = arith.constant 0 : i32
    return %c0_i32, %c0_i32_0 : i32, i32
  }
  func.func @transform_2(%arg0: i32) -> (i32, i32) {
    %c0_i32 = arith.constant 0 : i32
    %c0_i32_0 = arith.constant 0 : i32
    %c0_i32_1 = arith.constant 0 : i32
    return %c0_i32, %c0_i32_0 : i32, i32
  }
  func.func @transform_3(%arg0: i32) -> (i32, i32) {
    %c0_i32 = arith.constant 0 : i32
    %c0_i32_0 = arith.constant 0 : i32
    %c0_i32_1 = arith.constant 0 : i32
    return %c0_i32, %c0_i32_0 : i32, i32
  }
  func.func @transform_4(%arg0: i32) -> i32 {
    %c0_i32 = arith.constant 0 : i32
    %c0_i32_0 = arith.constant 0 : i32
    return %c0_i32 : i32
  }
  func.func @transform_5(%arg0: i32) -> (i32, i32, i32) {
    %c0_i32 = arith.constant 0 : i32
    %c0_i32_0 = arith.constant 0 : i32
    %c0_i32_1 = arith.constant 0 : i32
    return %arg0, %c0_i32, %c0_i32_0 : i32, i32, i32
  }
}

</mosaic_0001>

<bundles_post_ra>
// kernel: tpu_custom_call.1
= control target key start
LH: loop header
LB: loop body
LE: loop exit
PB: predicated region body
PF: predicated region fallthrough
CT: control target
= control target key end

     0   :  { %11 = vsyncpa [#allocation4], 0  ;;  %s780_s0 = inlined_call_operand.hbm [shape: bf16[2,32,128], index: 0, kind: input, shape index: {}]   ;;  %s781_s1 = inlined_call_operand.hbm [shape: f32[16,32], index: 1, kind: input, shape index: {}]   ;;  %s782_s2 = inlined_call_operand.hbm [shape: f32[32,1], index: 2, kind: input, shape index: {}]   ;;  %s783_s3 = inlined_call_operand.hbm [shape: f32[16,32], index: 3, kind: input, shape index: {}]   ;;  %s784_s4 = inlined_call_operand.<no memory space> [shape: f32[1], index: 4, kind: input, shape index: {}]   ;;  %s785_s5 = inlined_call_operand.hbm [shape: f32[2,16,32], index: 5, kind: output, shape index: {}]  }
   0x1   :  { %12 = vsyncpa [#allocation7], 0 }
   0x2   :  { %13 = vsyncpa [#allocation10], 0 }
   0x3   :  { %14 = vsyncpa [#allocation5], 0  ;;  %s598_s18 = smov [#allocation6]   ;;  %s472_s22 = scalar_lea.hbm %s781_s1, 256 }
   0x4   :  { %s32_s19 = sshll.u32 %s598_s18, 4  ;;  %p473_p0 = scmp.ne.s32.totalorder %s781_s1, %s472_s22  ;;  %s33_s19 = int_to_ptr.vmem [resolvable:$true] %s32_s19 }
   0x5   :  { %p476_p1 = scmp.lt.u32.totalorder %s472_s22, %s781_s1 }
   0x7   :  { %p478_p2 = pnand %p476_p1, %p473_p0 }
   0x9   :  { %481 = shalt.err (!%p478_p2)
}
   0xa   :  { %s482_s27 = scalar_lea.vmem %s33_s19, 256  ;;  %p487_p4 = scmp.lt.s32.totalorder %s33_s19, %s33_s19 }
   0xb   :  { %p483_p3 = scmp.ne.s32.totalorder %s33_s19, %s482_s27  ;;  %p488_p5 = scmp.lt.s32.totalorder %s482_s27, %s482_s27 }
   0xd   :  { %p489_p6 = por %p488_p5, %p487_p4 }
   0xf   :  { %p490_p7 = pnand %p489_p6, %p483_p3 }
  0x11   :  { %493 = shalt.err (!%p490_p7)
}
  0x12   :  { %s599_s28 = smov 128   ;;  %s600_s29 = smov 8  }
  0x13   :  { %38 = dma.hbm_to_vmem [thread:$0]  %s781_s1, 256, %s33_s19, [#allocation7], %s599_s28, %s599_s28, %s600_s29  }
  0x14   :  { %s601_s7 = smov [#allocation3]   ;;  %s494_s11 = scalar_lea.hbm %s780_s0, 512 }
  0x15   :  { %s20_s8 = sshll.u32 %s601_s7, 4  ;;  %p495_p8 = scmp.ne.s32.totalorder %s780_s0, %s494_s11  ;;  %s21_s8 = int_to_ptr.vmem [resolvable:$true] %s20_s8 }
  0x16   :  { %p498_p9 = scmp.lt.u32.totalorder %s494_s11, %s780_s0 }
  0x18   :  { %p500_p10 = pnand %p498_p9, %p495_p8 }
  0x1a   :  { %503 = shalt.err (!%p500_p10)
}
  0x1b   :  { %s504_s16 = scalar_lea.vmem %s21_s8, 512  ;;  %p509_p12 = scmp.lt.s32.totalorder %s21_s8, %s21_s8 }
  0x1c   :  { %p505_p11 = scmp.ne.s32.totalorder %s21_s8, %s504_s16  ;;  %p510_p13 = scmp.lt.s32.totalorder %s504_s16, %s504_s16 }
  0x1e   :  { %p511_p0 = por %p510_p13, %p509_p12 }
  0x20   :  { %p512_p1 = pnand %p511_p0, %p505_p11 }
  0x22   :  { %515 = shalt.err (!%p512_p1)
}
  0x23   :  { %s602_s1 = smov 64   ;;  %s603_s17 = smov 4  }
  0x24   :  { %26 = dma.hbm_to_vmem [thread:$0]  %s780_s0, 512, %s21_s8, [#allocation4], %s602_s1, %s602_s1, %s603_s17  }
  0x25   :  { %s604_s20 = smov [#allocation8]   ;;  %s605_s22 = smov [#allocation9]  }
  0x26   :  { %s44_s21 = sshll.u32 %s604_s20, 4  ;;  %s56_s23 = sshll.u32 %s605_s22, 4  ;;  %s45_s21 = int_to_ptr.vmem [resolvable:$true] %s44_s21  ;;  %s667_s23 = int_to_ptr.vmem [resolvable:$true] %s56_s23 }
  0x27   :  { %s516_s26 = scalar_lea.hbm %s782_s2, 512 }
  0x28   :  { %p517_p2 = scmp.ne.s32.totalorder %s782_s2, %s516_s26  ;;  %p520_p3 = scmp.lt.u32.totalorder %s516_s26, %s782_s2 }
  0x2a   :  { %p522_p4 = pnand %p520_p3, %p517_p2 }
  0x2c   :  { %525 = shalt.err (!%p522_p4)
}
  0x2d   :  { %s526_s0 = scalar_lea.vmem %s45_s21, 512  ;;  %p531_p6 = scmp.lt.s32.totalorder %s45_s21, %s45_s21 }
  0x2e   :  { %p527_p5 = scmp.ne.s32.totalorder %s45_s21, %s526_s0  ;;  %p532_p7 = scmp.lt.s32.totalorder %s526_s0, %s526_s0 }
  0x30   :  { %p533_p8 = por %p532_p7, %p531_p6 }
  0x32   :  { %p534_p9 = pnand %p533_p8, %p527_p5 }
  0x34   :  { %537 = shalt.err (!%p534_p9)
}
  0x35   :  { %50 = dma.hbm_to_vmem [thread:$0]  %s782_s2, 512, %s45_s21, [#allocation7], %s599_s28, %s599_s28, %s600_s29  }
  0x36   :  { %s538_s12 = scalar_lea.hbm %s783_s3, 256 }
  0x37   :  { %p539_p10 = scmp.ne.s32.totalorder %s783_s3, %s538_s12  ;;  %p542_p11 = scmp.lt.u32.totalorder %s538_s12, %s783_s3 }
  0x39   :  { %p544_p12 = pnand %p542_p11, %p539_p10 }
  0x3b   :  { %547 = shalt.err (!%p544_p12)
}
  0x3c   :  { %s548_s1 = scalar_lea.vmem %s667_s23, 256  ;;  %p553_p0 = scmp.lt.s32.totalorder %s667_s23, %s667_s23 }
  0x3d   :  { %p549_p13 = scmp.ne.s32.totalorder %s667_s23, %s548_s1  ;;  %p554_p1 = scmp.lt.s32.totalorder %s548_s1, %s548_s1 }
  0x3f   :  { %p555_p2 = por %p554_p1, %p553_p0 }
  0x41   :  { %p556_p3 = pnand %p555_p2, %p549_p13 }
  0x43   :  { %559 = shalt.err (!%p556_p3)
}
  0x44   :  { %62 = dma.hbm_to_vmem [thread:$0]  %s783_s3, 256, %s667_s23, [#allocation10], %s599_s28, %s599_s28, %s600_s29  }
  0x45   :  { %586 = dma.done.wait [#allocation4], 512  }
  0x46   :  { %587 = vsyncadd [#allocation4], 4294966784 }
  0x47   :  { %588 = dma.done.wait [#allocation7], 768  }
  0x48   :  { %589 = vsyncadd [#allocation7], 4294966528 }
  0x49   :  { %590 = dma.done.wait [#allocation10], 256  }
  0x4a   :  { %591 = vsyncadd [#allocation10], 4294967040  ;;  %v88_v0 = vlaneseq  ;;  %v707_v2 = vld [vmem:[#allocation8] sm:$0xff]  ;;  %v709_v3 = vld [vmem:[#allocation8 + $0x8] sm:$0xff]  ;;  %s725_s3 = smov 0  }
  0x4b   :  { %v711_v4 = vld [vmem:[#allocation8 + $0x10] sm:$0xff]  ;;  %v713_v5 = vld [vmem:[#allocation8 + $0x18] sm:$0xff]  ;;  %v715_v6 = vld [vmem:[#allocation9] sm:$0xff] }
  0x4c   :  { %v704_v1 = vand.u32 127, %v88_v0  ;;  %v717_v7 = vld [vmem:[#allocation9 + $0x8] sm:$0xff]  ;;  %v719_v8 = vld [vmem:[#allocation6] sm:$0xff]  ;;  %v721_v9 = vld [vmem:[#allocation6 + $0x8] sm:$0xff] }
  0x4d   :  { %v87_v10 = vpack.c.bf16 %v721_v9, %v719_v8 }
  0x4e   :  { %vm90_vm0 = vcmp.lt.s32.totalorder %v704_v1, 64 }
  0x4f LB: > { %v606_v11 = vmov 0.0   ;;  %vm607_vm1 = vmmov 0   ;;  %s399_s18 = sshll.u32 %s596_s3, 4  ;;  %v608_v12 = vmov 0   ;;  %vm183_vm2 = vcmask 261120   ;;  %s96_s3 = sadd.s32 1, %s596_s3   ;;  %s596_s3 = sphi %s725_s3, %s96_s3  }
  0x50   : > { %406 = vmatprep.subr.bf16.mxu0 %v606_v11  ;;  %410 = vmatprep.mubr.msk.bf16.mxu0 %vm607_vm1, %v606_v11  ;;  %s99_s19 = scalar_lea.vmem [#allocation3], %s399_s18  ;;  %s362_s23 = scalar_lea.vmem [#allocation11], %s399_s18 }
  0x51   : > { %444 = vset.pattern.permute.xlu0 %v608_v12  ;;  %445 = vset.pattern.permute.xlu1 %v608_v12  ;;  %v100_v13 = vld [vmem:[%s99_s19] sm:$0xff]   ;;  %v102_v14 = vld [vmem:[%s99_s19 + $0x8] sm:$0xff]   ;;  %p93_p4 = scmp.ge.s32.totalorder %s96_s3, 2  }
  0x52   : > { %114 = vperm.xlu0 %444, %v707_v2   ;;  %124 = vperm.xlu1 %445, %v711_v4   ;;  %v104_v15 = vunpack.c.l.bf16 %v100_v13  ;;  %v105_v16 = vunpack.c.h.bf16 %v100_v13  ;;  %v106_v19 = vunpack.c.l.bf16 %v102_v14  ;;  %v107_v21 = vunpack.c.h.bf16 %v102_v14  ;;  %s609_s24 = smov (%p93_p4), [#allocation11]  }
  0x53   : > { %414 = vmatprep.subr.bf16.mxu1 %v606_v11  ;;  %418 = vmatprep.mubr.msk.bf16.mxu1 %vm607_vm1, %v606_v11  ;;  %s370_s25 = sshll.u32 (%p93_p4), %s609_s24, 4  ;;  %s371_s25 = int_to_ptr.vmem [resolvable:$true] %s370_s25 }
  0x54   : > { %407 = vmatpush3.bf16.msra.mxu0 %v100_v13  ;;  %415 = vmatpush3.bf16.xpose.msra.mxu1 %v100_v13  ;;  %v149_v17 = vmul.f32 %v104_v15, %v104_v15  ;;  %v150_v18 = vmul.f32 %v105_v16, %v105_v16  ;;  %v151_v22 = vmul.f32 %v106_v19, %v106_v19  ;;  %v108_v49 = vmax.f32 %v104_v15, 0.0  ;;  %s560_s26 = scalar_lea.vmem (%p93_p4), %s371_s25, 512  ;;  %p565_p6 = scmp.lt.s32.totalorder (%p93_p4), %s371_s25, %s371_s25 }
  0x55   : > { %408 = vmatprep.subr.bf16.mxu0 %v606_v11  ;;  %416 = vmatprep.subr.bf16.mxu1 %v606_v11  ;;  %v152_v23 = vmul.f32 %v107_v21, %v107_v21  ;;  %v109_v50 = vmax.f32 %v105_v16, 0.0  ;;  %v110_v56 = vmax.f32 %v106_v19, 0.0  ;;  %v111_v62 = vmax.f32 %v107_v21, 0.0  ;;  %p561_p5 = scmp.ne.s32.totalorder (%p93_p4), %s371_s25, %s560_s26  ;;  %p566_p7 = scmp.lt.s32.totalorder (%p93_p4), %s560_s26, %s560_s26 }
  0x56   : > { %119 = vperm.xlu0 %444, %v709_v3   ;;  %129 = vperm.xlu1 %445, %v713_v5   ;;  %v153_v20 = vadd.f32 %v150_v18, %v149_v17 }
  0x57   :  { %p567_p8 = por (%p93_p4), %p566_p7, %p565_p6 }
  0x58   : > { %409 = vmatpush3.bf16.msra.mxu0 %v102_v14  ;;  %v154_v24 = vadd.f32 %v153_v20, %v151_v22 }
  0x59   :  { %p568_p9 = pnand (%p93_p4), %p567_p8, %p561_p5 }
  0x5a   : > { %v155_v25 = vadd.f32 %v154_v24, %v152_v23 }
  0x5b   : > { %411 = vmatmul.mubr.msk.bf16.vlgmr.msra.gmra.mrb[0].mxu0 %vm183_vm2, %v87_v10 }
  0x5c   : > { %417 = vmatpush3.bf16.xpose.msra.mxu1 %v102_v14  ;;  %v156_v26 = vrot.slane %v155_v25, 4 }
  0x5e   : > { %v157_v27 = vadd.f32 %v156_v26, %v155_v25 }
  0x60   : > { %v158_v28 = vrot.slane %v157_v27, 2 }
  0x62   : > { %v159_v29 = vadd.f32 %v158_v28, %v157_v27 }
  0x64   : > { %v160_v30 = vrot.slane %v159_v29, 1 }
  0x66   : > { %v161_v31 = vadd.f32 %v160_v30, %v159_v29 }
  0x68   : > { %450 = vrsqrt.f32 %v161_v31  ;;  %vm164_vm3 = vcmp.eq.f32.partialorder %v161_v31, inf  ;;  %v167_v34 = vand.u32 2147483648, %v161_v31  ;;  %vm166_vm4 = vcmp.eq.f32.partialorder %v161_v31, 0.0 }
  0x72   : > { %v451_v32 = vpop.eup %450 }
  0x73   : > { %v163_v33 = vmul.f32 %v451_v32, %v161_v31  ;;  %v145_v32 = vstv %s784_s4 }
  0x75   : > { %v165_v35 = vsel %vm164_vm3, %v161_v31, %v163_v33 }
  0x76   : > { %v168_v36 = vsel %vm166_vm4, %v167_v34, %v165_v35 }
  0x77   : > { %v169_v37 = vmax.f32 %v168_v36, 1e-12 }
  0x79   : > { %452 = vrcp.f32 %v169_v37 }
  0x83   : > { %v741_v38 = vpop.eup %452 }
  0xd1   : > { %v115_v45 = vpop.permute.xlu0 %114  ;;  %v125_v53 = vpop.permute.xlu1 %124 }
  0xd2   : > { %v132_v55 = vmul.f32 %v115_v45, %v108_v49  ;;  %v134_v60 = vmul.f32 %v125_v53, %v110_v56 }
  0xd5   : > { %v120_v51 = vpop.permute.xlu0 %119  ;;  %v130_v63 = vpop.permute.xlu1 %129 }
  0xd6   : > { %v133_v57 = vmul.f32 %v120_v51, %v109_v50  ;;  %v135_v14 = vmul.f32 %v130_v63, %v111_v62 }
  0xd8   : > { %v136_v61 = vadd.f32 %v133_v57, %v132_v55 }
  0xda   : > { %v137_v15 = vadd.f32 %v136_v61, %v134_v60 }
  0xdc   : > { %v138_v16 = vadd.f32 %v137_v15, %v135_v14 }
  0xde   : > { %v139_v17 = vrot.slane %v138_v16, 4 }
  0xe0   : > { %v140_v20 = vadd.f32 %v139_v17, %v138_v16 }
  0xe2   : > { %v141_v24 = vrot.slane %v140_v20, 2 }
  0xe4   : > { %v142_v21 = vadd.f32 %v141_v24, %v140_v20 }
  0xe6   : > { %v143_v28 = vrot.slane %v142_v21, 1 }
  0xe8   : > { %v144_v31 = vadd.f32 %v143_v28, %v142_v21 }
  0xea   : > { %v146_v33 = vadd.f32 %v145_v32, %v144_v31 }
  0xec   : > { %v147_v34 = vmax.f32 %v146_v33, 0.0 }
 0x12e   : > { %v221_v39 = vpop.f32.mrb[0].mxu0 }
 0x12f   : > { %v412_v40 = vpop.f32.mrb[1].mxu0  ;;  %v228_v42 = vmul.f32 %v741_v38, %v221_v39  ;;  %v148_v39 = vsel %vm90_vm0, %v147_v34, 0.0 }
 0x130   : > { %v224_v41 = vpop.f32.mrb[2].mxu0 }
 0x131   : > { %v229_v43 = vmul.f32 %v741_v38, %v224_v41  ;;  %v413_v44 = vpop.f32.mrb[3].mxu0 }
 0x133   : > { %v230_v46 = vmax.f32 %v228_v42, %v229_v43 }
 0x135   : > { %v231_v47 = vrot.slane %v230_v46, 4 }
 0x137   : > { %v232_v48 = vmax.f32 %v230_v46, %v231_v47 }
 0x139   : > { %v233_v52 = vrot.slane %v232_v48, 2 }
 0x13b   : > { %v234_v54 = vmax.f32 %v232_v48, %v233_v52 }
 0x13d   : > { %v235_v58 = vrot.slane %v234_v54, 1 }
 0x13f   : > { %v236_v59 = vmax.f32 %v234_v54, %v235_v58 }
 0x141   : > { %v237_v0 = vsub.f32 %v228_v42, %v236_v59  ;;  %v238_v11 = vsub.f32 %v229_v43, %v236_v59 }
 0x143   : > { %v239_v12 = vmul.f32 1.442695, %v237_v0  ;;  %v241_v13 = vmul.f32 1.442695, %v238_v11 }
 0x145   : > { %454 = vpow2.f32 %v239_v12 }
 0x146   : > { %456 = vpow2.f32 %v241_v13 }
 0x14f   : > { %v455_v18 = vpop.eup %454 }
 0x150   : > { %v457_v19 = vpop.eup %456 }
 0x151   : > { %v243_v22 = vadd.f32 %v457_v19, %v455_v18 }
 0x153   : > { %v244_v23 = vrot.slane %v243_v22, 4 }
 0x155   : > { %v245_v25 = vadd.f32 %v244_v23, %v243_v22 }
 0x157   : > { %v246_v26 = vrot.slane %v245_v25, 2 }
 0x159   : > { %v247_v27 = vadd.f32 %v246_v26, %v245_v25 }
 0x15b   : > { %v248_v29 = vrot.slane %v247_v27, 1 }
 0x15d   : > { %v249_v30 = vadd.f32 %v248_v29, %v247_v27 }
 0x15f   : > { %458 = vrcp.f32 %v249_v30 }
 0x169   : > { %v459_v35 = vpop.eup %458 }
 0x16a   : > { %v252_v36 = vmul.f32 %v459_v35, %v457_v19  ;;  %v251_v37 = vmul.f32 %v459_v35, %v455_v18 }
 0x16c   : > { %v254_v40 = vmul.f32 %v252_v36, %v148_v39  ;;  %v253_v41 = vmul.f32 %v251_v37, %v148_v39 }
 0x16e   : > { %301 = vadd.xlane.f32.xlu1 %v254_v40  ;;  %v256_v42 = vmul.f32 %v741_v38, %v254_v40  ;;  %299 = vadd.xlane.f32.xlu0 %v253_v41  ;;  %v255_v43 = vmul.f32 %v741_v38, %v253_v41 }
 0x170   : > { %v257_v44 = vpack.c.bf16 %v256_v42, %v255_v43 }
 0x172   : > { %419 = vmatmul.mubr.bf16.vlgmr.msra.gmra.mrb[0].mxu1 %v257_v44 }
 0x1fb   : > { %v300_v45 = vpop.xlane.xlu0 %299  ;;  %v302_v46 = vpop.xlane.xlu1 %301 }
 0x1fc   : > { %v303_v47 = vmul.f32 %v300_v45, %v715_v6  ;;  %v304_v49 = vmul.f32 %v302_v46, %v717_v7 }
 0x245   : > { %v292_v48 = vpop.f32.mrb[0].mxu1 }
 0x246   : > { %v305_v50 = vsub.f32 %v292_v48, %v303_v47  ;;  %v420_v51 = vpop.f32.mrb[1].mxu1 }
 0x247   : > { %v295_v52 = vpop.f32.mrb[2].mxu1 }
 0x248   : > { %v306_v53 = vsub.f32 %v295_v52, %v304_v49  ;;  %v421_v54 = vpop.f32.mrb[3].mxu1  ;;  %v307_v55 = vmul.f32 %v305_v50, %v305_v50 }
 0x24a   : > { %v309_v56 = vsel %vm183_vm2, %v307_v55, 0.0  ;;  %v308_v57 = vmul.f32 %v306_v53, %v306_v53 }
 0x24b   : > { %310 = vadd.xlane.f32.xlu0 %v309_v56 }
 0x24c   : > { %v312_v38 = vsel %vm183_vm2, %v308_v57, 0.0 }
 0x24f   : > { %313 = vadd.xlane.f32.xlu0 %v312_v38 }
 0x2d8   : > { %v311_v58 = vpop.xlane.xlu0 %310 }
 0x2d9   : > { %460 = vrsqrt.f32 %v311_v58  ;;  %vm317_vm5 = vcmp.eq.f32.partialorder %v311_v58, inf  ;;  %v320_v62 = vand.u32 2147483648, %v311_v58  ;;  %vm319_vm6 = vcmp.eq.f32.partialorder %v311_v58, 0.0 }
 0x2dc   : > { %v314_v59 = vpop.xlane.xlu0 %313 }
 0x2dd   : > { %462 = vrsqrt.f32 %v314_v59  ;;  %vm324_vm7 = vcmp.eq.f32.partialorder %v314_v59, inf  ;;  %v327_v14 = vand.u32 2147483648, %v314_v59  ;;  %vm326_vm8 = vcmp.eq.f32.partialorder %v314_v59, 0.0 }
 0x2e3   : > { %v461_v60 = vpop.eup %460 }
 0x2e4   : > { %v316_v61 = vmul.f32 %v461_v60, %v311_v58 }
 0x2e6   : > { %v318_v63 = vsel %vm317_vm5, %v311_v58, %v316_v61 }
 0x2e7   : > { %v463_v0 = vpop.eup %462  ;;  %v321_v11 = vsel %vm319_vm6, %v320_v62, %v318_v63 }
 0x2e8   : > { %v329_v12 = vmax.f32 %v321_v11, 1e-12  ;;  %v323_v13 = vmul.f32 %v463_v0, %v314_v59 }
 0x2ea   : > { %464 = vrcp.f32 %v329_v12  ;;  %v325_v15 = vsel %vm324_vm7, %v314_v59, %v323_v13 }
 0x2eb   : > { %v328_v16 = vsel %vm326_vm8, %v327_v14, %v325_v15 }
 0x2ec   : > { %v330_v17 = vmax.f32 %v328_v16, 1e-12 }
 0x2ee   : > { %466 = vrcp.f32 %v330_v17 }
 0x2f4   : > { %v465_v18 = vpop.eup %464 }
 0x2f5   : > { %v333_v20 = vmul.f32 %v465_v18, %v305_v50 }
 0x2f7   : > { %v335_v23 = vmul.f32 %v333_v20, %v333_v20 }
 0x2f8   : > { %v467_v19 = vpop.eup %466 }
 0x2f9   : > { %v334_v22 = vmul.f32 %v467_v19, %v306_v53  ;;  %v337_v25 = vsel %vm183_vm2, %v335_v23, 0.0 }
 0x2fb   : > { %v336_v24 = vmul.f32 %v334_v22, %v334_v22 }
 0x2fd   : > { %v338_v26 = vsel %vm183_vm2, %v336_v24, 0.0 }
 0x2fe   : > { %v339_v21 = vadd.f32 %v338_v26, %v337_v25 }
 0x300   : > { %340 = vadd.xlane.f32.xlu1 %v339_v21 }
 0x38d   : > { %v341_v27 = vpop.xlane.xlu1 %340 }
 0x38e   : > { %v342_v28 = vrot.slane %v341_v27, 4 }
 0x390   : > { %v343_v29 = vadd.f32 %v342_v28, %v341_v27 }
 0x392   : > { %v344_v30 = vrot.slane %v343_v29, 2 }
 0x394   : > { %v345_v31 = vadd.f32 %v344_v30, %v343_v29 }
 0x396   : > { %v346_v32 = vrot.slane %v345_v31, 1 }
 0x398   : > { %v347_v33 = vadd.f32 %v346_v32, %v345_v31 }
 0x39a   : > { %422 = vpush %v347_v33 }
 0x3cb   : > { %s423_s22 = spop %422 }
 0x3cc   : > { %v349_v34 = vstv %s423_s22 }
 0x3cd   : > { %468 = vrsqrt.f32 %v349_v34  ;;  %vm352_vm9 = vcmp.eq.f32.partialorder %v349_v34, inf  ;;  %v355_v37 = vand.u32 2147483648, %v349_v34  ;;  %vm354_vm10 = vcmp.eq.f32.partialorder %v349_v34, 0.0 }
 0x3d7   : > { %v469_v35 = vpop.eup %468 }
 0x3d8   : > { %v351_v36 = vmul.f32 %v469_v35, %v349_v34 }
 0x3da   : > { %v353_v39 = vsel %vm352_vm9, %v349_v34, %v351_v36 }
 0x3db   : > { %v356_v40 = vsel %vm354_vm10, %v355_v37, %v353_v39 }
 0x3dc   : > { %v357_v41 = vmax.f32 %v356_v40, 1e-12 }
 0x3de   : > { %470 = vrcp.f32 %v357_v41 }
 0x3e5   :  { %95 = sbr.rel (!%p93_p4) target bundleno = 79 (0x4f), region = 65 }
 0x3e8   : > { %v471_v42 = vpop.eup %470 }
 0x3e9   : > { %v359_v43 = vmul.f32 %v471_v42, %v333_v20  ;;  %v360_v44 = vmul.f32 %v471_v42, %v334_v22 }
 0x3eb   : > { %363 = vst.msk [vmem:[%s362_s23] sm:$0xff] %vm183_vm2, %v359_v43  ;;  %364 = vst.msk [vmem:[%s362_s23 + $0x8] sm:$0xff] %vm183_vm2, %v360_v44 }
 0x3ec   :  { %571 = shalt.err (!%p568_p9)
}
 0x3ed   :  { %s572_s6 = scalar_lea.hbm %s785_s5, 512 }
 0x3ee   :  { %p573_p10 = scmp.ne.s32.totalorder %s785_s5, %s572_s6  ;;  %p576_p11 = scmp.lt.u32.totalorder %s572_s6, %s785_s5 }
 0x3f0   :  { %p578_p12 = pnand %p576_p11, %p573_p10 }
 0x3f2   :  { %581 = shalt.err (!%p578_p12)
}
 0x3f3   :  { %376 = dma.vmem_to_hbm [thread:$0]  %s371_s25, 512, %s785_s5, [#allocation5], %s599_s28, %s599_s28, %s600_s29  }
 0x3f4   :  { %592 = dma.done.wait [#allocation5], 512  }
 0x3f5   :  { %593 = vsyncadd [#allocation5], 4294966784 }
 0x3f6   :  { %380 = vsyncpa [#allocation4], 1 }
 0x3f7   :  { %381 = vsyncpa [#allocation7], 1 }
 0x3f8   :  { %382 = vsyncpa [#allocation10], 1 }
 0x3f9   :  { %383 = vsyncpa [#allocation5], 1 }

</bundles_post_ra>
